<compile_context>
chip_gen: v7x
topology: tpu7x:2x2x1
jax: 0.10.0
libtpu: 0.0.40
codegen_flags: <defaults>
</compile_context>

<pallas_src>
import jax
import jax.numpy as jnp
from jax.experimental import pallas as pl
from jax.experimental.pallas import tpu as pltpu

F_PAD = 128          # lane-padded feature width
IN_DIM = 2
HIDDEN = 50
LATENT = 6

# Lane layout of the single packed output slab.
Y_OFF = 0                      # y        -> lanes [0, 50)
MU_OFF = HIDDEN                # mu       -> lanes [50, 56)
SP_OFF = MU_OFF + LATENT       # stddev_p -> lanes [56, 62)
Z_OFF = 64                     # z        -> lanes [64, 70)
XH_OFF = 120                   # xhat     -> lanes [120, 122)

# Weight slab indices.
W_E1, W_E2, W_E3, W_HEAD_A, W_HEAD_B, W_D1, W_D2, W_D3 = range(8)


def _vae_kernel(xe_ref, w_ref, b_ref, out_ref):
    xe = xe_ref[...]                                   # (TM, 128) f32
    lane = jax.lax.broadcasted_iota(jnp.int32, xe.shape, 1)

    def lin(h, i):
        # (TM,128) @ (128,128) + (1,128)
        return jnp.dot(h, w_ref[i], preferred_element_type=jnp.float32) + b_ref[i]

    # Encoder: 2 -> 50 -> ReLU -> 50 -> ReLU -> 50 -> ReLU   (y at lanes 0:50)
    h = jnp.maximum(lin(xe, W_E1), 0.0)
    h = jnp.maximum(lin(h, W_E2), 0.0)
    h = jnp.maximum(lin(h, W_E3), 0.0)

    # Fused heads:
    #   head_a: mu at lanes 50:56, stddev_p at 56:62, duplicate mu at 64:70
    #   head_b: stddev_p at lanes 64:70 (aligned with eps / z lanes)
    head_a = lin(h, W_HEAD_A)
    head_b = lin(h, W_HEAD_B)

    # Reparameterization (purely elementwise; everything already lane-aligned):
    #   lanes 64:70 become z = mu + eps * exp(stddev_p / 2); lanes 50:62 keep mu/sp.
    eps = jnp.where((lane >= Z_OFF) & (lane < Z_OFF + LATENT), xe, 0.0)
    enc = head_a + eps * jnp.exp(head_b * 0.5)

    # Decoder: 6 -> 50 -> ReLU -> 50 -> ReLU -> 2 -> Sigmoid
    # (Wd1 rows are non-zero only at lanes 64:70, so only z feeds the decoder.)
    d = jnp.maximum(lin(enc, W_D1), 0.0)
    d = jnp.maximum(lin(d, W_D2), 0.0)
    logits = lin(d, W_D3)                              # real logits at lanes 120:122
    xhat = jnp.where((lane >= XH_OFF) & (lane < XH_OFF + IN_DIM),
                     jax.nn.sigmoid(logits), 0.0)

    # Single lane-dense packed store: y | mu | sp | z | xhat, disjoint lanes.
    out_ref[...] = h + enc + xhat


def _round_up(n, m):
    return ((n + m - 1) // m) * m


def _pack_params(params):
    """Pack PyTorch-shaped weights into one (8,128,128) slab + (8,1,128) biases."""
    W = jnp.zeros((8, F_PAD, F_PAD), jnp.float32)
    B = jnp.zeros((8, 1, F_PAD), jnp.float32)

    def put_w(W, i, w_pt, row, col):
        wt = jnp.asarray(w_pt, jnp.float32).T          # (in, out)
        return W.at[i, row:row + wt.shape[0], col:col + wt.shape[1]].set(wt)

    def put_b(B, i, b_pt, col):
        b = jnp.asarray(b_pt, jnp.float32)
        return B.at[i, 0, col:col + b.shape[0]].set(b)

    # Encoder trunk.
    W = put_w(W, W_E1, params["We1"], 0, Y_OFF); B = put_b(B, W_E1, params["be1"], Y_OFF)
    W = put_w(W, W_E2, params["We2"], 0, Y_OFF); B = put_b(B, W_E2, params["be2"], Y_OFF)
    W = put_w(W, W_E3, params["We3"], 0, Y_OFF); B = put_b(B, W_E3, params["be3"], Y_OFF)
    # Head A: mu @ 50:56, stddev_p @ 56:62, duplicate mu @ 64:70 (for z).
    W = put_w(W, W_HEAD_A, params["Wmu"], 0, MU_OFF);  B = put_b(B, W_HEAD_A, params["bmu"], MU_OFF)
    W = put_w(W, W_HEAD_A, params["Wstd"], 0, SP_OFF); B = put_b(B, W_HEAD_A, params["bstd"], SP_OFF)
    W = put_w(W, W_HEAD_A, params["Wmu"], 0, Z_OFF);   B = put_b(B, W_HEAD_A, params["bmu"], Z_OFF)
    # Head B: stddev_p @ 64:70 (aligned with eps lanes for the exp term).
    W = put_w(W, W_HEAD_B, params["Wstd"], 0, Z_OFF);  B = put_b(B, W_HEAD_B, params["bstd"], Z_OFF)
    # Decoder.
    W = put_w(W, W_D1, params["Wd1"], Z_OFF, Y_OFF);   B = put_b(B, W_D1, params["bd1"], Y_OFF)
    W = put_w(W, W_D2, params["Wd2"], 0, Y_OFF);       B = put_b(B, W_D2, params["bd2"], Y_OFF)
    W = put_w(W, W_D3, params["Wd3"], 0, XH_OFF);      B = put_b(B, W_D3, params["bd3"], XH_OFF)
    return W, B


def vae_forward(x, eps, params, tm=256):
    """x: (N, 2) f32, eps: (N, 6) f32, params: dict of PyTorch-shaped arrays."""
    N = x.shape[0]
    n8 = _round_up(N, 8)
    tm = min(tm, n8)                 # keep >= 1 full tile; tm stays a multiple of 8
    n_pad = _round_up(N, tm)

    # Packed input slab: x -> lanes 0:2, eps -> lanes 64:70.
    xe = jnp.zeros((n_pad, F_PAD), jnp.float32)
    xe = xe.at[:N, 0:IN_DIM].set(x.astype(jnp.float32))
    xe = xe.at[:N, Z_OFF:Z_OFF + LATENT].set(eps.astype(jnp.float32))

    W, B = _pack_params(params)

    grid = (n_pad // tm,)
    row_spec = pl.BlockSpec((tm, F_PAD), lambda i: (i, 0))
    w_spec = pl.BlockSpec((8, F_PAD, F_PAD), lambda i: (0, 0, 0))
    b_spec = pl.BlockSpec((8, 1, F_PAD), lambda i: (0, 0, 0))

    out = pl.pallas_call(
        _vae_kernel,
        grid=grid,
        in_specs=[row_spec, w_spec, b_spec],
        out_specs=row_spec,
        out_shape=jax.ShapeDtypeStruct((n_pad, F_PAD), jnp.float32),
        compiler_params=pltpu.CompilerParams(
            dimension_semantics=("parallel",)),
    )(xe, W, B)

    y = out[:N, Y_OFF:Y_OFF + HIDDEN]
    mean = out[:N, MU_OFF:MU_OFF + LATENT]
    stddev_p = out[:N, SP_OFF:SP_OFF + LATENT]
    z = out[:N, Z_OFF:Z_OFF + LATENT]
    xhat = out[:N, XH_OFF:XH_OFF + IN_DIM]
    return y, mean, stddev_p, z, xhat


def _reference_forward(x, eps, params):
    def lin(h, w, b):
        return h @ w.T + b
    h = jax.nn.relu(lin(x, params["We1"], params["be1"]))
    h = jax.nn.relu(lin(h, params["We2"], params["be2"]))
    h = jax.nn.relu(lin(h, params["We3"], params["be3"]))
    mu = lin(h, params["Wmu"], params["bmu"])
    sp = lin(h, params["Wstd"], params["bstd"])
    z = mu + eps * jnp.exp(sp / 2.0)
    d = jax.nn.relu(lin(z, params["Wd1"], params["bd1"]))
    d = jax.nn.relu(lin(d, params["Wd2"], params["bd2"]))
    xhat = jax.nn.sigmoid(lin(d, params["Wd3"], params["bd3"]))
    return h, mu, sp, z, xhat


def _init_params(key):
    shapes = {
        "We1": (HIDDEN, IN_DIM), "be1": (HIDDEN,),
        "We2": (HIDDEN, HIDDEN), "be2": (HIDDEN,),
        "We3": (HIDDEN, HIDDEN), "be3": (HIDDEN,),
        "Wmu": (LATENT, HIDDEN), "bmu": (LATENT,),
        "Wstd": (LATENT, HIDDEN), "bstd": (LATENT,),
        "Wd1": (HIDDEN, LATENT), "bd1": (HIDDEN,),
        "Wd2": (HIDDEN, HIDDEN), "bd2": (HIDDEN,),
        "Wd3": (IN_DIM, HIDDEN), "bd3": (IN_DIM,),
    }
    params = {}
    for name, shape in shapes.items():
        key, sub = jax.random.split(key)
        params[name] = 0.1 * jax.random.normal(sub, shape, dtype=jnp.float32)
    return params, key


if __name__ == "__main__":
    key = jax.random.PRNGKey(0)
    params, key = _init_params(key)

    names = ["y", "mean", "stddev_p", "z", "xhat"]
    # N=8 exercises the single-tile path; N=300 exercises row padding + grid > 1
    # (so both v7x TensorCores get work).
    for N in (8, 300):
        key, kx, ke = jax.random.split(key, 3)
        x = jax.random.normal(kx, (N, IN_DIM), dtype=jnp.float32)
        # torch.randn in forward() is replaced by a deterministic JAX sample
        # passed into the kernel so the reparameterization is reproducible.
        eps = jax.random.normal(ke, (N, LATENT), dtype=jnp.float32)

        outs = jax.block_until_ready(vae_forward(x, eps, params))
        refs = _reference_forward(x, eps, params)
        for name, o, r in zip(names, outs, refs):
            assert o.shape == r.shape, (name, o.shape, r.shape)
            err = float(jnp.max(jnp.abs(o - r)))
            assert err < 1e-4, (name, err)

    print("KERNEL_OK")
</pallas_src>

<mosaic_0001>
module attributes {stable_mosaic.version = 11 : i64} {
  func.func @_vae_kernel(%arg0: i32, %arg1: memref<8x128xf32, #tpu.memory_space<vmem>>, %arg2: memref<8x128x128xf32, #tpu.memory_space<vmem>>, %arg3: memref<8x1x128xf32, #tpu.memory_space<vmem>>, %arg4: memref<8x128xf32, #tpu.memory_space<vmem>>) attributes {dimension_semantics = [#tpu.dimension_semantics<parallel>], iteration_bounds = array<i64: 1>, scalar_prefetch = 0 : i64, scratch_operands = 0 : i64, tpu.core_type = #tpu.core_type<tc>, window_params = [{transform_indices = @transform_0, window_bounds = array<i64: 8, 128>}, {pipeline_mode = #tpu.pipeline_mode<synchronous>, transform_indices = @transform_1, window_bounds = array<i64: 8, 128, 128>}, {pipeline_mode = #tpu.pipeline_mode<synchronous>, transform_indices = @transform_2, window_bounds = array<i64: 8, 1, 128>}, {transform_indices = @transform_3, window_bounds = array<i64: 8, 128>}]} {
    %c0 = arith.constant 0 : index
    %c0_0 = arith.constant 0 : index
    %0 = vector.load %arg1[%c0, %c0_0] : memref<8x128xf32, #tpu.memory_space<vmem>>, vector<8x128xf32>
    %1 = tpu.iota {dimensions = array<i32: 1>} : vector<8x128xi32>
    %c0_1 = arith.constant 0 : index
    %c0_2 = arith.constant 0 : index
    %c0_3 = arith.constant 0 : index
    %2 = vector.load %arg2[%c0_1, %c0_2, %c0_3] : memref<8x128x128xf32, #tpu.memory_space<vmem>>, vector<1x128x128xf32>
    %3 = vector.shape_cast %2 : vector<1x128x128xf32> to vector<128x128xf32>
    %cst = arith.constant dense<0.000000e+00> : vector<8x128xf32>
    %4 = tpu.matmul %0, %3, %cst {dimension_numbers = #tpu.dot_dimension_numbers<[1], [0], [0], [1], [0, 0, 1, 1], [], []>} : vector<8x128xf32>, vector<128x128xf32>, vector<8x128xf32> -> vector<8x128xf32>
    %c0_4 = arith.constant 0 : index
    %c0_5 = arith.constant 0 : index
    %c0_6 = arith.constant 0 : index
    %5 = vector.load %arg3[%c0_4, %c0_5, %c0_6] : memref<8x1x128xf32, #tpu.memory_space<vmem>>, vector<1x1x128xf32>
    %6 = vector.shape_cast %5 : vector<1x1x128xf32> to vector<1x128xf32>
    %7 = vector.broadcast %6 : vector<1x128xf32> to vector<8x128xf32>
    %8 = arith.addf %4, %7 : vector<8x128xf32>
    %cst_7 = arith.constant 0.000000e+00 : f32
    %9 = vector.broadcast %cst_7 : f32 to vector<8x128xf32>
    %10 = arith.maximumf %8, %9 : vector<8x128xf32>
    %c1 = arith.constant 1 : index
    %c0_8 = arith.constant 0 : index
    %c0_9 = arith.constant 0 : index
    %11 = vector.load %arg2[%c1, %c0_8, %c0_9] : memref<8x128x128xf32, #tpu.memory_space<vmem>>, vector<1x128x128xf32>
    %12 = vector.shape_cast %11 : vector<1x128x128xf32> to vector<128x128xf32>
    %cst_10 = arith.constant dense<0.000000e+00> : vector<8x128xf32>
    %13 = tpu.matmul %10, %12, %cst_10 {dimension_numbers = #tpu.dot_dimension_numbers<[1], [0], [0], [1], [0, 0, 1, 1], [], []>} : vector<8x128xf32>, vector<128x128xf32>, vector<8x128xf32> -> vector<8x128xf32>
    %c1_11 = arith.constant 1 : index
    %c0_12 = arith.constant 0 : index
    %c0_13 = arith.constant 0 : index
    %14 = vector.load %arg3[%c1_11, %c0_12, %c0_13] : memref<8x1x128xf32, #tpu.memory_space<vmem>>, vector<1x1x128xf32>
    %15 = vector.shape_cast %14 : vector<1x1x128xf32> to vector<1x128xf32>
    %16 = vector.broadcast %15 : vector<1x128xf32> to vector<8x128xf32>
    %17 = arith.addf %13, %16 : vector<8x128xf32>
    %cst_14 = arith.constant 0.000000e+00 : f32
    %18 = vector.broadcast %cst_14 : f32 to vector<8x128xf32>
    %19 = arith.maximumf %17, %18 : vector<8x128xf32>
    %c2 = arith.constant 2 : index
    %c0_15 = arith.constant 0 : index
    %c0_16 = arith.constant 0 : index
    %20 = vector.load %arg2[%c2, %c0_15, %c0_16] : memref<8x128x128xf32, #tpu.memory_space<vmem>>, vector<1x128x128xf32>
    %21 = vector.shape_cast %20 : vector<1x128x128xf32> to vector<128x128xf32>
    %cst_17 = arith.constant dense<0.000000e+00> : vector<8x128xf32>
    %22 = tpu.matmul %19, %21, %cst_17 {dimension_numbers = #tpu.dot_dimension_numbers<[1], [0], [0], [1], [0, 0, 1, 1], [], []>} : vector<8x128xf32>, vector<128x128xf32>, vector<8x128xf32> -> vector<8x128xf32>
    %c2_18 = arith.constant 2 : index
    %c0_19 = arith.constant 0 : index
    %c0_20 = arith.constant 0 : index
    %23 = vector.load %arg3[%c2_18, %c0_19, %c0_20] : memref<8x1x128xf32, #tpu.memory_space<vmem>>, vector<1x1x128xf32>
    %24 = vector.shape_cast %23 : vector<1x1x128xf32> to vector<1x128xf32>
    %25 = vector.broadcast %24 : vector<1x128xf32> to vector<8x128xf32>
    %26 = arith.addf %22, %25 : vector<8x128xf32>
    %cst_21 = arith.constant 0.000000e+00 : f32
    %27 = vector.broadcast %cst_21 : f32 to vector<8x128xf32>
    %28 = arith.maximumf %26, %27 : vector<8x128xf32>
    %c3 = arith.constant 3 : index
    %c0_22 = arith.constant 0 : index
    %c0_23 = arith.constant 0 : index
    %29 = vector.load %arg2[%c3, %c0_22, %c0_23] : memref<8x128x128xf32, #tpu.memory_space<vmem>>, vector<1x128x128xf32>
    %30 = vector.shape_cast %29 : vector<1x128x128xf32> to vector<128x128xf32>
    %cst_24 = arith.constant dense<0.000000e+00> : vector<8x128xf32>
    %31 = tpu.matmul %28, %30, %cst_24 {dimension_numbers = #tpu.dot_dimension_numbers<[1], [0], [0], [1], [0, 0, 1, 1], [], []>} : vector<8x128xf32>, vector<128x128xf32>, vector<8x128xf32> -> vector<8x128xf32>
    %c3_25 = arith.constant 3 : index
    %c0_26 = arith.constant 0 : index
    %c0_27 = arith.constant 0 : index
    %32 = vector.load %arg3[%c3_25, %c0_26, %c0_27] : memref<8x1x128xf32, #tpu.memory_space<vmem>>, vector<1x1x128xf32>
    %33 = vector.shape_cast %32 : vector<1x1x128xf32> to vector<1x128xf32>
    %34 = vector.broadcast %33 : vector<1x128xf32> to vector<8x128xf32>
    %35 = arith.addf %31, %34 : vector<8x128xf32>
    %c4 = arith.constant 4 : index
    %c0_28 = arith.constant 0 : index
    %c0_29 = arith.constant 0 : index
    %36 = vector.load %arg2[%c4, %c0_28, %c0_29] : memref<8x128x128xf32, #tpu.memory_space<vmem>>, vector<1x128x128xf32>
    %37 = vector.shape_cast %36 : vector<1x128x128xf32> to vector<128x128xf32>
    %cst_30 = arith.constant dense<0.000000e+00> : vector<8x128xf32>
    %38 = tpu.matmul %28, %37, %cst_30 {dimension_numbers = #tpu.dot_dimension_numbers<[1], [0], [0], [1], [0, 0, 1, 1], [], []>} : vector<8x128xf32>, vector<128x128xf32>, vector<8x128xf32> -> vector<8x128xf32>
    %c4_31 = arith.constant 4 : index
    %c0_32 = arith.constant 0 : index
    %c0_33 = arith.constant 0 : index
    %39 = vector.load %arg3[%c4_31, %c0_32, %c0_33] : memref<8x1x128xf32, #tpu.memory_space<vmem>>, vector<1x1x128xf32>
    %40 = vector.shape_cast %39 : vector<1x1x128xf32> to vector<1x128xf32>
    %41 = vector.broadcast %40 : vector<1x128xf32> to vector<8x128xf32>
    %42 = arith.addf %38, %41 : vector<8x128xf32>
    %c64_i32 = arith.constant 64 : i32
    %43 = vector.broadcast %c64_i32 : i32 to vector<8x128xi32>
    %44 = arith.cmpi sge, %1, %43 : vector<8x128xi32>
    %c70_i32 = arith.constant 70 : i32
    %45 = vector.broadcast %c70_i32 : i32 to vector<8x128xi32>
    %46 = arith.cmpi slt, %1, %45 : vector<8x128xi32>
    %47 = arith.andi %44, %46 : vector<8x128xi1>
    %cst_34 = arith.constant 0.000000e+00 : f32
    %48 = vector.broadcast %cst_34 : f32 to vector<8x128xf32>
    %49 = arith.select %47, %0, %48 : vector<8x128xi1>, vector<8x128xf32>
    %cst_35 = arith.constant 5.000000e-01 : f32
    %50 = vector.broadcast %cst_35 : f32 to vector<8x128xf32>
    %51 = arith.mulf %42, %50 : vector<8x128xf32>
    %52 = math.exp %51 : vector<8x128xf32>
    %53 = arith.mulf %49, %52 : vector<8x128xf32>
    %54 = arith.addf %35, %53 : vector<8x128xf32>
    %c5 = arith.constant 5 : index
    %c0_36 = arith.constant 0 : index
    %c0_37 = arith.constant 0 : index
    %55 = vector.load %arg2[%c5, %c0_36, %c0_37] : memref<8x128x128xf32, #tpu.memory_space<vmem>>, vector<1x128x128xf32>
    %56 = vector.shape_cast %55 : vector<1x128x128xf32> to vector<128x128xf32>
    %cst_38 = arith.constant dense<0.000000e+00> : vector<8x128xf32>
    %57 = tpu.matmul %54, %56, %cst_38 {dimension_numbers = #tpu.dot_dimension_numbers<[1], [0], [0], [1], [0, 0, 1, 1], [], []>} : vector<8x128xf32>, vector<128x128xf32>, vector<8x128xf32> -> vector<8x128xf32>
    %c5_39 = arith.constant 5 : index
    %c0_40 = arith.constant 0 : index
    %c0_41 = arith.constant 0 : index
    %58 = vector.load %arg3[%c5_39, %c0_40, %c0_41] : memref<8x1x128xf32, #tpu.memory_space<vmem>>, vector<1x1x128xf32>
    %59 = vector.shape_cast %58 : vector<1x1x128xf32> to vector<1x128xf32>
    %60 = vector.broadcast %59 : vector<1x128xf32> to vector<8x128xf32>
    %61 = arith.addf %57, %60 : vector<8x128xf32>
    %cst_42 = arith.constant 0.000000e+00 : f32
    %62 = vector.broadcast %cst_42 : f32 to vector<8x128xf32>
    %63 = arith.maximumf %61, %62 : vector<8x128xf32>
    %c6 = arith.constant 6 : index
    %c0_43 = arith.constant 0 : index
    %c0_44 = arith.constant 0 : index
    %64 = vector.load %arg2[%c6, %c0_43, %c0_44] : memref<8x128x128xf32, #tpu.memory_space<vmem>>, vector<1x128x128xf32>
    %65 = vector.shape_cast %64 : vector<1x128x128xf32> to vector<128x128xf32>
    %cst_45 = arith.constant dense<0.000000e+00> : vector<8x128xf32>
    %66 = tpu.matmul %63, %65, %cst_45 {dimension_numbers = #tpu.dot_dimension_numbers<[1], [0], [0], [1], [0, 0, 1, 1], [], []>} : vector<8x128xf32>, vector<128x128xf32>, vector<8x128xf32> -> vector<8x128xf32>
    %c6_46 = arith.constant 6 : index
    %c0_47 = arith.constant 0 : index
    %c0_48 = arith.constant 0 : index
    %67 = vector.load %arg3[%c6_46, %c0_47, %c0_48] : memref<8x1x128xf32, #tpu.memory_space<vmem>>, vector<1x1x128xf32>
    %68 = vector.shape_cast %67 : vector<1x1x128xf32> to vector<1x128xf32>
    %69 = vector.broadcast %68 : vector<1x128xf32> to vector<8x128xf32>
    %70 = arith.addf %66, %69 : vector<8x128xf32>
    %cst_49 = arith.constant 0.000000e+00 : f32
    %71 = vector.broadcast %cst_49 : f32 to vector<8x128xf32>
    %72 = arith.maximumf %70, %71 : vector<8x128xf32>
    %c7 = arith.constant 7 : index
    %c0_50 = arith.constant 0 : index
    %c0_51 = arith.constant 0 : index
    %73 = vector.load %arg2[%c7, %c0_50, %c0_51] : memref<8x128x128xf32, #tpu.memory_space<vmem>>, vector<1x128x128xf32>
    %74 = vector.shape_cast %73 : vector<1x128x128xf32> to vector<128x128xf32>
    %cst_52 = arith.constant dense<0.000000e+00> : vector<8x128xf32>
    %75 = tpu.matmul %72, %74, %cst_52 {dimension_numbers = #tpu.dot_dimension_numbers<[1], [0], [0], [1], [0, 0, 1, 1], [], []>} : vector<8x128xf32>, vector<128x128xf32>, vector<8x128xf32> -> vector<8x128xf32>
    %c7_53 = arith.constant 7 : index
    %c0_54 = arith.constant 0 : index
    %c0_55 = arith.constant 0 : index
    %76 = vector.load %arg3[%c7_53, %c0_54, %c0_55] : memref<8x1x128xf32, #tpu.memory_space<vmem>>, vector<1x1x128xf32>
    %77 = vector.shape_cast %76 : vector<1x1x128xf32> to vector<1x128xf32>
    %78 = vector.broadcast %77 : vector<1x128xf32> to vector<8x128xf32>
    %79 = arith.addf %75, %78 : vector<8x128xf32>
    %c120_i32 = arith.constant 120 : i32
    %80 = vector.broadcast %c120_i32 : i32 to vector<8x128xi32>
    %81 = arith.cmpi sge, %1, %80 : vector<8x128xi32>
    %c122_i32 = arith.constant 122 : i32
    %82 = vector.broadcast %c122_i32 : i32 to vector<8x128xi32>
    %83 = arith.cmpi slt, %1, %82 : vector<8x128xi32>
    %84 = arith.andi %81, %83 : vector<8x128xi1>
    %85 = arith.negf %79 : vector<8x128xf32>
    %86 = math.exp %85 : vector<8x128xf32>
    %cst_56 = arith.constant 1.000000e+00 : f32
    %87 = vector.broadcast %cst_56 : f32 to vector<8x128xf32>
    %88 = arith.addf %87, %86 : vector<8x128xf32>
    %89 = arith.divf %87, %88 : vector<8x128xf32>
    %cst_57 = arith.constant 0.000000e+00 : f32
    %90 = vector.broadcast %cst_57 : f32 to vector<8x128xf32>
    %91 = arith.select %84, %89, %90 : vector<8x128xi1>, vector<8x128xf32>
    %92 = arith.addf %28, %54 : vector<8x128xf32>
    %93 = arith.addf %92, %91 : vector<8x128xf32>
    %c0_58 = arith.constant 0 : index
    %c0_59 = arith.constant 0 : index
    %94 = vector.load %arg4[%c0_58, %c0_59] : memref<8x128xf32, #tpu.memory_space<vmem>>, vector<8x128xf32>
    tpu.vector_store %arg4[%c0_58, %c0_59], %93 {strides = array<i32>} : memref<8x128xf32, #tpu.memory_space<vmem>>, vector<8x128xf32>,
    return
  }
  func.func @transform_0(%arg0: i32) -> (i32, i32) {
    %c0_i32 = arith.constant 0 : i32
    %c0_i32_0 = arith.constant 0 : i32
    return %arg0, %c0_i32 : i32, i32
  }
  func.func @transform_1(%arg0: i32) -> (i32, i32, i32) {
    %c0_i32 = arith.constant 0 : i32
    %c0_i32_0 = arith.constant 0 : i32
    %c0_i32_1 = arith.constant 0 : i32
    %c0_i32_2 = arith.constant 0 : i32
    return %c0_i32, %c0_i32_0, %c0_i32_1 : i32, i32, i32
  }
  func.func @transform_2(%arg0: i32) -> (i32, i32, i32) {
    %c0_i32 = arith.constant 0 : i32
    %c0_i32_0 = arith.constant 0 : i32
    %c0_i32_1 = arith.constant 0 : i32
    %c0_i32_2 = arith.constant 0 : i32
    return %c0_i32, %c0_i32_0, %c0_i32_1 : i32, i32, i32
  }
  func.func @transform_3(%arg0: i32) -> (i32, i32) {
    %c0_i32 = arith.constant 0 : i32
    %c0_i32_0 = arith.constant 0 : i32
    return %arg0, %c0_i32 : i32, i32
  }
}

</mosaic_0001>

<bundles_post_ra>
// kernel: tpu_custom_call.1
= control target key start
LH: loop header
LB: loop body
LE: loop exit
PB: predicated region body
PF: predicated region fallthrough
CT: control target
= control target key end

     0   :  { %8 = vsyncpa [#allocation3], 0  ;;  %s1764_s0 = inlined_call_operand.hbm [shape: f32[8,128], index: 0, kind: input, shape index: {}]   ;;  %s1765_s1 = inlined_call_operand.hbm [shape: f32[8,128,128], index: 1, kind: input, shape index: {}]   ;;  %s1766_s2 = inlined_call_operand.hbm [shape: f32[8,1,128], index: 2, kind: input, shape index: {}]   ;;  %s1767_s3 = inlined_call_operand.hbm [shape: f32[8,128], index: 3, kind: output, shape index: {}]  }
   0x1   :  { %9 = vsyncpa [#allocation6], 0 }
   0x2   :  { %10 = vsyncpa [#allocation4], 0  ;;  %s1586_s12 = smov [#allocation5]   ;;  %s1492_s16 = scalar_lea.hbm %s1765_s1, 16384 }
   0x3   :  { %s26_s13 = sshll.u32 %s1586_s12, 4  ;;  %p1493_p0 = scmp.ne.s32.totalorder %s1765_s1, %s1492_s16  ;;  %s27_s13 = int_to_ptr.vmem [resolvable:$true] %s26_s13 }
   0x4   :  { %p1496_p1 = scmp.lt.u32.totalorder %s1492_s16, %s1765_s1 }
   0x6   :  { %p1498_p2 = pnand %p1496_p1, %p1493_p0 }
   0x8   :  { %1501 = shalt.err (!%p1498_p2)
}
   0x9   :  { %s1502_s21 = scalar_lea.vmem %s27_s13, 16384  ;;  %p1507_p4 = scmp.lt.s32.totalorder %s27_s13, %s27_s13 }
   0xa   :  { %p1503_p3 = scmp.ne.s32.totalorder %s27_s13, %s1502_s21  ;;  %p1508_p5 = scmp.lt.s32.totalorder %s1502_s21, %s1502_s21 }
   0xc   :  { %p1509_p6 = por %p1508_p5, %p1507_p4 }
   0xe   :  { %p1510_p7 = pnand %p1509_p6, %p1503_p3 }
  0x10   :  { %1513 = shalt.err (!%p1510_p7)
}
  0x11   :  { %s1587_s22 = smov 128   ;;  %s1588_s23 = smov 8  }
  0x12   :  { %32 = dma.hbm_to_vmem [thread:$0]  %s1765_s1, 16384, %s27_s13, [#allocation6], %s1587_s22, %s1587_s22, %s1588_s23  }
  0x13   :  { %s1589_s26 = smov [#allocation2]   ;;  %s1590_s28 = smov [#allocation7]  }
  0x14   :  { %s17_s27 = sshll.u32 %s1589_s26, 4  ;;  %s38_s29 = sshll.u32 %s1590_s28, 4  ;;  %s18_s27 = int_to_ptr.vmem [resolvable:$true] %s17_s27  ;;  %s39_s29 = int_to_ptr.vmem [resolvable:$true] %s38_s29 }
  0x15   :  { %s1514_s5 = scalar_lea.hbm %s1764_s0, 128 }
  0x16   :  { %p1515_p8 = scmp.ne.s32.totalorder %s1764_s0, %s1514_s5  ;;  %p1518_p9 = scmp.lt.u32.totalorder %s1514_s5, %s1764_s0 }
  0x18   :  { %p1520_p10 = pnand %p1518_p9, %p1515_p8 }
  0x1a   :  { %1523 = shalt.err (!%p1520_p10)
}
  0x1b   :  { %s1524_s1 = scalar_lea.vmem %s18_s27, 128  ;;  %p1529_p12 = scmp.lt.s32.totalorder %s18_s27, %s18_s27 }
  0x1c   :  { %p1525_p11 = scmp.ne.s32.totalorder %s18_s27, %s1524_s1  ;;  %p1530_p13 = scmp.lt.s32.totalorder %s1524_s1, %s1524_s1 }
  0x1e   :  { %p1531_p0 = por %p1530_p13, %p1529_p12 }
  0x20   :  { %p1532_p1 = pnand %p1531_p0, %p1525_p11 }
  0x22   :  { %1535 = shalt.err (!%p1532_p1)
}
  0x23   :  { %20 = dma.hbm_to_vmem [thread:$0]  %s1764_s0, 128, %s18_s27, [#allocation3]  }
  0x24   :  { %s1536_s14 = scalar_lea.hbm %s1766_s2, 128 }
  0x25   :  { %p1537_p2 = scmp.ne.s32.totalorder %s1766_s2, %s1536_s14  ;;  %p1540_p3 = scmp.lt.u32.totalorder %s1536_s14, %s1766_s2 }
  0x27   :  { %p1542_p4 = pnand %p1540_p3, %p1537_p2 }
  0x29   :  { %1545 = shalt.err (!%p1542_p4)
}
  0x2a   :  { %s1546_s19 = scalar_lea.vmem %s39_s29, 128  ;;  %p1551_p6 = scmp.lt.s32.totalorder %s39_s29, %s39_s29 }
  0x2b   :  { %p1547_p5 = scmp.ne.s32.totalorder %s39_s29, %s1546_s19  ;;  %p1552_p7 = scmp.lt.s32.totalorder %s1546_s19, %s1546_s19 }
  0x2d   :  { %p1553_p8 = por %p1552_p7, %p1551_p6 }
  0x2f   :  { %p1554_p9 = pnand %p1553_p8, %p1547_p5 }
  0x31   :  { %1557 = shalt.err (!%p1554_p9)
}
  0x32   :  { %s1591_s0 = smov 16   ;;  %s1592_s20 = smov 1  }
  0x33   :  { %44 = dma.hbm_to_vmem [thread:$0]  %s1766_s2, 128, %s39_s29, [#allocation6], %s1591_s0, %s1591_s0, %s1592_s20  }
  0x34   :  { %1580 = dma.done.wait [#allocation3], 128  }
  0x35   :  { %1581 = vsyncadd [#allocation3], 4294967168 }
  0x36   :  { %1582 = dma.done.wait [#allocation6], 16512  }
  0x37   :  { %1583 = vsyncadd [#allocation6], 4294950784  ;;  %v1593_v0 = vmov 0.0|0.0   ;;  %vm1594_vm0 = vmmov 0   ;;  %v1595_v1 = vmov 0.0   ;;  %v57_v2 = vld [vmem:[#allocation5] sm:$0xff] }
  0x38   :  { %1283 = vmatprep.subr.bf16.mxu0 %v1593_v0  ;;  %1035 = vmatprep.mubr.msk.f32.mxu0 %vm1594_vm0, %v1595_v1  ;;  %v58_v3 = vld [vmem:[#allocation5 + $0x8] sm:$0xff]  ;;  %v59_v4 = vld [vmem:[#allocation5 + $0x10] sm:$0xff]  ;;  %v60_v6 = vld [vmem:[#allocation5 + $0x18] sm:$0xff]  ;;  %s1596_s2 = smov [#allocation8]  }
  0x39   :  { %1307 = vmatprep.subr.bf16.mxu1 %v1593_v0  ;;  %1070 = vmatprep.mubr.msk.f32.mxu1 %vm1594_vm0, %v1595_v1  ;;  %v1284_v5 = vpack.c.bf16 %v58_v3, %v57_v2  ;;  %v1287_v7 = vpack.c.bf16 %v60_v6, %v59_v4  ;;  %v61_v8 = vld [vmem:[#allocation5 + $0x20] sm:$0xff]  ;;  %v62_v9 = vld [vmem:[#allocation5 + $0x28] sm:$0xff]  ;;  %v154_v12 = vld [vmem:[#allocation5 + $0x90] sm:$0xff]  ;;  %s848_s23 = sshll.u32 %s1596_s2, 4  ;;  %s849_s23 = int_to_ptr.vmem [resolvable:$true] %s848_s23 }
  0x3a   :  { %v152_v10 = vld [vmem:[#allocation5 + $0x80] sm:$0xff]  ;;  %v153_v11 = vld [vmem:[#allocation5 + $0x88] sm:$0xff]  ;;  %v155_v13 = vld [vmem:[#allocation5 + $0x98] sm:$0xff]  ;;  %v1290_v14 = vpack.c.bf16 %v62_v9, %v61_v8  ;;  %s1558_s24 = scalar_lea.vmem %s849_s23, 128  ;;  %p1563_p11 = scmp.lt.s32.totalorder %s849_s23, %s849_s23 }
  0x3b   :  { %1285 = vmatpush3.bf16.msra.mxu0 %v1284_v5  ;;  %v1308_v15 = vpack.c.bf16 %v153_v11, %v152_v10  ;;  %v63_v16 = vld [vmem:[#allocation5 + $0x30] sm:$0xff]  ;;  %v64_v17 = vld [vmem:[#allocation5 + $0x38] sm:$0xff]  ;;  %v1311_v18 = vpack.c.bf16 %v155_v13, %v154_v12  ;;  %v156_v19 = vld [vmem:[#allocation5 + $0xa0] sm:$0xff]  ;;  %p1559_p10 = scmp.ne.s32.totalorder %s849_s23, %s1558_s24  ;;  %p1564_p12 = scmp.lt.s32.totalorder %s1558_s24, %s1558_s24 }
  0x3c   :  { %1286 = vmatprep.subr.bf16.mxu0 %v1593_v0  ;;  %v157_v20 = vld [vmem:[#allocation5 + $0xa8] sm:$0xff]  ;;  %v1293_v21 = vpack.c.bf16 %v64_v17, %v63_v16  ;;  %v65_v22 = vld [vmem:[#allocation5 + $0x40] sm:$0xff]  ;;  %v158_v25 = vld [vmem:[#allocation5 + $0xb0] sm:$0xff] }
  0x3d   :  { %1309 = vmatpush3.bf16.msra.mxu1 %v1308_v15  ;;  %v66_v23 = vld [vmem:[#allocation5 + $0x48] sm:$0xff]  ;;  %v1314_v24 = vpack.c.bf16 %v157_v20, %v156_v19  ;;  %v159_v26 = vld [vmem:[#allocation5 + $0xb8] sm:$0xff]  ;;  %v67_v28 = vld [vmem:[#allocation5 + $0x50] sm:$0xff]  ;;  %p1565_p13 = por %p1564_p12, %p1563_p11 }
  0x3e   :  { %1310 = vmatprep.subr.bf16.mxu1 %v1593_v0  ;;  %v1296_v27 = vpack.c.bf16 %v66_v23, %v65_v22  ;;  %v68_v29 = vld [vmem:[#allocation5 + $0x58] sm:$0xff]  ;;  %v1317_v30 = vpack.c.bf16 %v159_v26, %v158_v25  ;;  %v160_v31 = vld [vmem:[#allocation5 + $0xc0] sm:$0xff]  ;;  %v161_v32 = vld [vmem:[#allocation5 + $0xc8] sm:$0xff] }
  0x3f   :  { %1288 = vmatpush3.bf16.msra.mxu0 %v1287_v7  ;;  %v1299_v33 = vpack.c.bf16 %v68_v29, %v67_v28  ;;  %v69_v34 = vld [vmem:[#allocation5 + $0x60] sm:$0xff]  ;;  %v70_v35 = vld [vmem:[#allocation5 + $0x68] sm:$0xff]  ;;  %v1320_v36 = vpack.c.bf16 %v161_v32, %v160_v31  ;;  %v162_v37 = vld [vmem:[#allocation5 + $0xd0] sm:$0xff]  ;;  %p1566_p0 = pnand %p1565_p13, %p1559_p10 }
  0x40   :  { %1289 = vmatprep.subr.bf16.mxu0 %v1593_v0  ;;  %v163_v38 = vld [vmem:[#allocation5 + $0xd8] sm:$0xff]  ;;  %v1302_v39 = vpack.c.bf16 %v70_v35, %v69_v34  ;;  %v71_v40 = vld [vmem:[#allocation5 + $0x70] sm:$0xff]  ;;  %v164_v43 = vld [vmem:[#allocation5 + $0xe0] sm:$0xff] }
  0x41   :  { %1312 = vmatpush3.bf16.msra.mxu1 %v1311_v18  ;;  %v72_v41 = vld [vmem:[#allocation5 + $0x78] sm:$0xff]  ;;  %v1323_v42 = vpack.c.bf16 %v163_v38, %v162_v37  ;;  %v165_v44 = vld [vmem:[#allocation5 + $0xe8] sm:$0xff]  ;;  %v166_v48 = vld [vmem:[#allocation5 + $0xf0] sm:$0xff] }
  0x42   :  { %1313 = vmatprep.subr.bf16.mxu1 %v1593_v0  ;;  %v1305_v45 = vpack.c.bf16 %v72_v41, %v71_v40  ;;  %v1326_v46 = vpack.c.bf16 %v165_v44, %v164_v43  ;;  %v1672_v47 = vld [vmem:[#allocation2] sm:$0xff]  ;;  %v248_v51 = vld [vmem:[#allocation5 + $0x100] sm:$0xff]  ;;  %v249_v52 = vld [vmem:[#allocation5 + $0x108] sm:$0xff] }
  0x43   :  { %1291 = vmatpush3.bf16.msra.mxu0 %v1290_v14  ;;  %v167_v49 = vld [vmem:[#allocation5 + $0xf8] sm:$0xff]  ;;  %v250_v53 = vld [vmem:[#allocation5 + $0x110] sm:$0xff]  ;;  %v1332_v54 = vpack.c.bf16 %v249_v52, %v248_v51  ;;  %v252_v57 = vld [vmem:[#allocation5 + $0x120] sm:$0xff] }
  0x44   :  { %1292 = vmatprep.subr.bf16.mxu0 %v1593_v0  ;;  %v1329_v50 = vpack.c.bf16 %v167_v49, %v166_v48  ;;  %v251_v55 = vld [vmem:[#allocation5 + $0x118] sm:$0xff]  ;;  %v253_v58 = vld [vmem:[#allocation5 + $0x128] sm:$0xff]  ;;  %v254_v60 = vld [vmem:[#allocation5 + $0x130] sm:$0xff] }
  0x45   :  { %1315 = vmatpush3.bf16.msra.mxu1 %v1314_v24  ;;  %v1335_v56 = vpack.c.bf16 %v251_v55, %v250_v53  ;;  %v1338_v59 = vpack.c.bf16 %v253_v58, %v252_v57  ;;  %v255_v61 = vld [vmem:[#allocation5 + $0x138] sm:$0xff]  ;;  %v256_v63 = vld [vmem:[#allocation5 + $0x140] sm:$0xff]  ;;  %v257_v2 = vld [vmem:[#allocation5 + $0x148] sm:$0xff] }
  0x46   :  { %1316 = vmatprep.subr.bf16.mxu1 %v1593_v0  ;;  %v1341_v62 = vpack.c.bf16 %v255_v61, %v254_v60  ;;  %v1344_v3 = vpack.c.bf16 %v257_v2, %v256_v63  ;;  %v258_v4 = vld [vmem:[#allocation5 + $0x150] sm:$0xff]  ;;  %v259_v5 = vld [vmem:[#allocation5 + $0x158] sm:$0xff]  ;;  %v260_v7 = vld [vmem:[#allocation5 + $0x160] sm:$0xff] }
  0x47   :  { %1294 = vmatpush3.bf16.msra.mxu0 %v1293_v21  ;;  %v1347_v6 = vpack.c.bf16 %v259_v5, %v258_v4  ;;  %v261_v8 = vld [vmem:[#allocation5 + $0x168] sm:$0xff]  ;;  %v858_v10 = vld [vmem:[#allocation7] ss:$0 sm:$0xff]  ;;  %v262_v15 = vld [vmem:[#allocation5 + $0x170] sm:$0xff] }
  0x48   :  { %1295 = vmatprep.subr.bf16.mxu0 %v1593_v0  ;;  %v1350_v9 = vpack.c.bf16 %v261_v8, %v260_v7  ;;  %v263_v16 = vld [vmem:[#allocation5 + $0x178] sm:$0xff]  ;;  %v344_v18 = vld [vmem:[#allocation5 + $0x180] sm:$0xff]  ;;  %v345_v19 = vld [vmem:[#allocation5 + $0x188] sm:$0xff] }
  0x49   :  { %1318 = vmatpush3.bf16.msra.mxu1 %v1317_v30  ;;  %v1353_v17 = vpack.c.bf16 %v263_v16, %v262_v15  ;;  %v1356_v20 = vpack.c.bf16 %v345_v19, %v344_v18  ;;  %v346_v21 = vld [vmem:[#allocation5 + $0x190] sm:$0xff]  ;;  %v347_v22 = vld [vmem:[#allocation5 + $0x198] sm:$0xff]  ;;  %v348_v24 = vld [vmem:[#allocation5 + $0x1a0] sm:$0xff] }
  0x4a   :  { %1319 = vmatprep.subr.bf16.mxu1 %v1593_v0  ;;  %v1359_v23 = vpack.c.bf16 %v347_v22, %v346_v21  ;;  %v349_v25 = vld [vmem:[#allocation5 + $0x1a8] sm:$0xff]  ;;  %v351_v28 = vld [vmem:[#allocation5 + $0x1b8] sm:$0xff]  ;;  %v352_v30 = vld [vmem:[#allocation5 + $0x1c0] sm:$0xff] }
  0x4b   :  { %1297 = vmatpush3.bf16.msra.mxu0 %v1296_v27  ;;  %v1362_v26 = vpack.c.bf16 %v349_v25, %v348_v24  ;;  %v350_v27 = vld [vmem:[#allocation5 + $0x1b0] sm:$0xff]  ;;  %v353_v31 = vld [vmem:[#allocation5 + $0x1c8] sm:$0xff]  ;;  %v355_v34 = vld [vmem:[#allocation5 + $0x1d8] sm:$0xff] }
  0x4c   :  { %1298 = vmatprep.subr.bf16.mxu0 %v1593_v0  ;;  %v1365_v29 = vpack.c.bf16 %v351_v28, %v350_v27  ;;  %v1368_v32 = vpack.c.bf16 %v353_v31, %v352_v30  ;;  %v357_v37 = vld [vmem:[#allocation5 + $0x1e8] sm:$0xff]  ;;  %v439_v40 = vld [vmem:[#allocation5 + $0x200] sm:$0xff]  ;;  %v441_v48 = vld [vmem:[#allocation5 + $0x210] sm:$0xff] }
  0x4d   :  { %1321 = vmatpush3.bf16.msra.mxu1 %v1320_v36  ;;  %v356_v36 = vld [vmem:[#allocation5 + $0x1e0] sm:$0xff]  ;;  %v440_v41 = vld [vmem:[#allocation5 + $0x208] sm:$0xff]  ;;  %v442_v49 = vld [vmem:[#allocation5 + $0x218] sm:$0xff] }
  0x4e   :  { %1322 = vmatprep.subr.bf16.mxu1 %v1593_v0  ;;  %v1374_v38 = vpack.c.bf16 %v357_v37, %v356_v36  ;;  %v443_v51 = vld [vmem:[#allocation5 + $0x220] sm:$0xff]  ;;  %v444_v52 = vld [vmem:[#allocation5 + $0x228] sm:$0xff]  ;;  %v446_v55 = vld [vmem:[#allocation5 + $0x238] sm:$0xff] }
  0x4f   :  { %1300 = vmatpush3.bf16.msra.mxu0 %v1299_v33  ;;  %v354_v33 = vld [vmem:[#allocation5 + $0x1d0] sm:$0xff]  ;;  %v1386_v53 = vpack.c.bf16 %v444_v52, %v443_v51  ;;  %v447_v57 = vld [vmem:[#allocation5 + $0x240] sm:$0xff]  ;;  %v448_v58 = vld [vmem:[#allocation5 + $0x248] sm:$0xff] }
  0x50   :  { %1301 = vmatprep.subr.bf16.mxu0 %v1593_v0  ;;  %v1371_v35 = vpack.c.bf16 %v355_v34, %v354_v33  ;;  %v449_v60 = vld [vmem:[#allocation5 + $0x250] sm:$0xff]  ;;  %v450_v61 = vld [vmem:[#allocation5 + $0x258] sm:$0xff]  ;;  %v451_v63 = vld [vmem:[#allocation5 + $0x260] sm:$0xff] }
  0x51   :  { %1324 = vmatpush3.bf16.msra.mxu1 %v1323_v42  ;;  %v452_v2 = vld [vmem:[#allocation5 + $0x268] sm:$0xff]  ;;  %v358_v4 = vld [vmem:[#allocation5 + $0x1f0] sm:$0xff]  ;;  %v359_v5 = vld [vmem:[#allocation5 + $0x1f8] sm:$0xff] }
  0x52   :  { %1325 = vmatprep.subr.bf16.mxu1 %v1593_v0  ;;  %v1377_v7 = vpack.c.bf16 %v359_v5, %v358_v4  ;;  %v454_v8 = vld [vmem:[#allocation5 + $0x278] sm:$0xff]  ;;  %v545_v18 = vld [vmem:[#allocation5 + $0x290] sm:$0xff]  ;;  %v547_v21 = vld [vmem:[#allocation5 + $0x2a0] sm:$0xff] }
  0x53   :  { %1303 = vmatpush3.bf16.msra.mxu0 %v1302_v39  ;;  %v859_v39 = vld [vmem:[#allocation7 + $0x1] ss:$0 sm:$0xff]  ;;  %v546_v19 = vld [vmem:[#allocation5 + $0x298] sm:$0xff]  ;;  %v548_v22 = vld [vmem:[#allocation5 + $0x2a8] sm:$0xff] }
  0x54   :  { %1304 = vmatprep.subr.bf16.mxu0 %v1593_v0  ;;  %v549_v24 = vld [vmem:[#allocation5 + $0x2b0] sm:$0xff]  ;;  %v550_v25 = vld [vmem:[#allocation5 + $0x2b8] sm:$0xff]  ;;  %v551_v27 = vld [vmem:[#allocation5 + $0x2c0] sm:$0xff] }
  0x55   :  { %1327 = vmatpush3.bf16.msra.mxu1 %v1326_v46  ;;  %v552_v28 = vld [vmem:[#allocation5 + $0x2c8] sm:$0xff]  ;;  %v553_v30 = vld [vmem:[#allocation5 + $0x2d0] sm:$0xff]  ;;  %v554_v31 = vld [vmem:[#allocation5 + $0x2d8] sm:$0xff] }
  0x56   :  { %1328 = vmatprep.subr.bf16.mxu1 %v1593_v0  ;;  %v555_v33 = vld [vmem:[#allocation5 + $0x2e0] sm:$0xff]  ;;  %v556_v34 = vld [vmem:[#allocation5 + $0x2e8] sm:$0xff]  ;;  %v557_v36 = vld [vmem:[#allocation5 + $0x2f0] sm:$0xff] }
  0x57   :  { %1306 = vmatpush3.bf16.msra.mxu0 %v1305_v45  ;;  %v1380_v45 = vpack.c.bf16 %v440_v41, %v439_v40  ;;  %v558_v37 = vld [vmem:[#allocation5 + $0x2f8] sm:$0xff]  ;;  %v640_v40 = vld [vmem:[#allocation5 + $0x308] sm:$0xff]  ;;  %v641_v41 = vld [vmem:[#allocation5 + $0x310] sm:$0xff] }
  0x58   :  { %1331 = vmatprep.subr.bf16.mxu0 %v1593_v0  ;;  %v647_v52 = vld [vmem:[#allocation5 + $0x340] sm:$0xff] }
  0x59   :  { %1330 = vmatpush3.bf16.msra.mxu1 %v1329_v50  ;;  %v1383_v50 = vpack.c.bf16 %v442_v49, %v441_v48  ;;  %v645_v49 = vld [vmem:[#allocation5 + $0x330] sm:$0xff] }
  0x5a   :  { %1036 = vmatmul.mubr.f32.vlgmr.msra.gmra.mrb[0].mxu0 %v1672_v47  ;;  %1355 = vmatprep.subr.bf16.mxu1 %v1593_v0 }
  0x5b   :  { %1105 = vmatprep.mubr.msk.f32.mxu0 %vm1594_vm0, %v1595_v1  ;;  %1333 = vmatpush3.bf16.msra.mxu0 %v1332_v54  ;;  %v445_v54 = vld [vmem:[#allocation5 + $0x230] sm:$0xff] }
  0x5c   :  { %1334 = vmatprep.subr.bf16.mxu0 %v1593_v0 }
  0x5f   :  { %1336 = vmatpush3.bf16.msra.mxu0 %v1335_v56  ;;  %v1389_v56 = vpack.c.bf16 %v446_v55, %v445_v54  ;;  %v649_v55 = vld [vmem:[#allocation5 + $0x350] sm:$0xff] }
  0x60   :  { %1337 = vmatprep.subr.bf16.mxu0 %v1593_v0 }
  0x63   :  { %1339 = vmatpush3.bf16.msra.mxu0 %v1338_v59  ;;  %v1392_v59 = vpack.c.bf16 %v448_v58, %v447_v57  ;;  %v651_v58 = vld [vmem:[#allocation5 + $0x360] sm:$0xff] }
  0x64   :  { %1340 = vmatprep.subr.bf16.mxu0 %v1593_v0 }
  0x67   :  { %1342 = vmatpush3.bf16.msra.mxu0 %v1341_v62  ;;  %v1395_v62 = vpack.c.bf16 %v450_v61, %v449_v60  ;;  %v862_v61 = vld [vmem:[#allocation7 + $0x4] ss:$0 sm:$0xff] }
  0x68   :  { %1343 = vmatprep.subr.bf16.mxu0 %v1593_v0 }
  0x6b   :  { %1345 = vmatpush3.bf16.msra.mxu0 %v1344_v3  ;;  %v1398_v3 = vpack.c.bf16 %v452_v2, %v451_v63  ;;  %v55_v2 = vlaneseq }
  0x6c   :  { %1346 = vmatprep.subr.bf16.mxu0 %v1593_v0 }
  0x6f   :  { %1348 = vmatpush3.bf16.msra.mxu0 %v1347_v6  ;;  %v453_v6 = vld [vmem:[#allocation5 + $0x270] sm:$0xff] }
  0x70   :  { %1349 = vmatprep.subr.bf16.mxu0 %v1593_v0 }
  0x73   :  { %1351 = vmatpush3.bf16.msra.mxu0 %v1350_v9  ;;  %v1401_v9 = vpack.c.bf16 %v454_v8, %v453_v6 }
  0x74   :  { %1352 = vmatprep.subr.bf16.mxu0 %v1593_v0 }
  0x77   :  { %1354 = vmatpush3.bf16.msra.mxu0 %v1353_v17 }
  0x78   :  { %1379 = vmatprep.subr.bf16.mxu0 %v1593_v0 }
 0x12d   :  { %v146_v11 = vpop.f32.mrb[0].mxu0 }
 0x12e   :  { %v147_v12 = vadd.f32 %v858_v10, %v146_v11  ;;  %v1037_v13 = vpop.f32.mrb[1].mxu0  ;;  %v860_v10 = vld [vmem:[#allocation7 + $0x2] ss:$0 sm:$0xff] }
 0x12f   :  { %v543_v11 = vld [vmem:[#allocation5 + $0x280] sm:$0xff] }
 0x130   :  { %v150_v14 = vmax.f32 %v147_v12, 0.0  ;;  %v544_v12 = vld [vmem:[#allocation5 + $0x288] sm:$0xff] }
 0x131   :  { %v1404_v16 = vpack.c.bf16 %v544_v12, %v543_v11 }
 0x132   :  { %1071 = vmatmul.mubr.f32.vlgmr.msra.gmra.mrb[0].mxu1 %v150_v14 }
 0x133   :  { %1140 = vmatprep.mubr.msk.f32.mxu1 %vm1594_vm0, %v1595_v1  ;;  %1357 = vmatpush3.bf16.msra.mxu1 %v1356_v20  ;;  %v1407_v20 = vpack.c.bf16 %v546_v19, %v545_v18  ;;  %v735_v19 = vld [vmem:[#allocation5 + $0x380] sm:$0xff] }
 0x134   :  { %1358 = vmatprep.subr.bf16.mxu1 %v1593_v0 }
 0x137   :  { %1360 = vmatpush3.bf16.msra.mxu1 %v1359_v23  ;;  %v1410_v23 = vpack.c.bf16 %v548_v22, %v547_v21  ;;  %v737_v21 = vld [vmem:[#allocation5 + $0x390] sm:$0xff] }
 0x138   :  { %1361 = vmatprep.subr.bf16.mxu1 %v1593_v0 }
 0x13b   :  { %1363 = vmatpush3.bf16.msra.mxu1 %v1362_v26  ;;  %v1413_v26 = vpack.c.bf16 %v550_v25, %v549_v24  ;;  %v739_v24 = vld [vmem:[#allocation5 + $0x3a0] sm:$0xff]  ;;  %v740_v25 = vld [vmem:[#allocation5 + $0x3a8] sm:$0xff] }
 0x13c   :  { %1364 = vmatprep.subr.bf16.mxu1 %v1593_v0 }
 0x13f   :  { %1366 = vmatpush3.bf16.msra.mxu1 %v1365_v29  ;;  %v1416_v29 = vpack.c.bf16 %v552_v28, %v551_v27  ;;  %v742_v27 = vld [vmem:[#allocation5 + $0x3b8] sm:$0xff] }
 0x140   :  { %1367 = vmatprep.subr.bf16.mxu1 %v1593_v0 }
 0x143   :  { %1369 = vmatpush3.bf16.msra.mxu1 %v1368_v32  ;;  %v1419_v32 = vpack.c.bf16 %v554_v31, %v553_v30  ;;  %v744_v30 = vld [vmem:[#allocation5 + $0x3c8] sm:$0xff] }
 0x144   :  { %1370 = vmatprep.subr.bf16.mxu1 %v1593_v0 }
 0x147   :  { %1372 = vmatpush3.bf16.msra.mxu1 %v1371_v35  ;;  %v1422_v35 = vpack.c.bf16 %v556_v34, %v555_v33  ;;  %v746_v33 = vld [vmem:[#allocation5 + $0x3d8] sm:$0xff] }
 0x148   :  { %1373 = vmatprep.subr.bf16.mxu1 %v1593_v0 }
 0x14b   :  { %1375 = vmatpush3.bf16.msra.mxu1 %v1374_v38  ;;  %v1425_v38 = vpack.c.bf16 %v558_v37, %v557_v36  ;;  %v748_v36 = vld [vmem:[#allocation5 + $0x3e8] sm:$0xff] }
 0x14c   :  { %1376 = vmatprep.subr.bf16.mxu1 %v1593_v0 }
 0x14f   :  { %1378 = vmatpush3.bf16.msra.mxu1 %v1377_v7  ;;  %v1731_v7 = vand.u32 127, %v55_v2 }
 0x150   :  { %1403 = vmatprep.subr.bf16.mxu1 %v1593_v0 }
 0x151   :  { %vm533_vm1 = vcmp.ge.s32.totalorder %v1731_v7, 64  ;;  %vm534_vm2 = vcmp.lt.s32.totalorder %v1731_v7, 70  ;;  %vm829_vm4 = vcmp.ge.s32.totalorder %v1731_v7, 120  ;;  %vm830_vm5 = vcmp.lt.s32.totalorder %v1731_v7, 122 }
 0x152   :  { %vm535_vm3 = vmand %vm533_vm1, %vm534_vm2 }
 0x153   :  { %vm831_vm6 = vmand %vm829_vm4, %vm830_vm5 }
 0x205   :  { %v242_v42 = vpop.f32.mrb[0].mxu1 }
 0x206   :  { %v243_v43 = vadd.f32 %v859_v39, %v242_v42  ;;  %v1072_v44 = vpop.f32.mrb[1].mxu1  ;;  %v639_v39 = vld [vmem:[#allocation5 + $0x300] sm:$0xff] }
 0x207   :  { %v1428_v42 = vpack.c.bf16 %v640_v40, %v639_v39 }
 0x208   :  { %v246_v46 = vmax.f32 %v243_v43, 0.0  ;;  %v642_v43 = vld [vmem:[#allocation5 + $0x318] sm:$0xff] }
 0x209   :  { %v1431_v44 = vpack.c.bf16 %v642_v43, %v641_v41  ;;  %v749_v43 = vld [vmem:[#allocation5 + $0x3f0] sm:$0xff] }
 0x20a   :  { %1106 = vmatmul.mubr.f32.vlgmr.msra.gmra.mrb[2].mxu0 %v246_v46  ;;  %v644_v46 = vld [vmem:[#allocation5 + $0x328] sm:$0xff] }
 0x20b   :  { %1381 = vmatpush3.bf16.msra.mxu0 %v1380_v45  ;;  %1175 = vmatprep.mubr.msk.f32.mxu0 %vm1594_vm0, %v1595_v1  ;;  %v643_v45 = vld [vmem:[#allocation5 + $0x320] sm:$0xff] }
 0x20c   :  { %1382 = vmatprep.subr.bf16.mxu0 %v1593_v0  ;;  %v1434_v48 = vpack.c.bf16 %v644_v46, %v643_v45  ;;  %v864_v46 = vld [vmem:[#allocation7 + $0x6] ss:$0 sm:$0xff] }
 0x20f   :  { %1384 = vmatpush3.bf16.msra.mxu0 %v1383_v50  ;;  %v646_v50 = vld [vmem:[#allocation5 + $0x338] sm:$0xff] }
 0x210   :  { %1385 = vmatprep.subr.bf16.mxu0 %v1593_v0  ;;  %v1437_v51 = vpack.c.bf16 %v646_v50, %v645_v49 }
 0x213   :  { %1387 = vmatpush3.bf16.msra.mxu0 %v1386_v53  ;;  %v648_v53 = vld [vmem:[#allocation5 + $0x348] sm:$0xff] }
 0x214   :  { %1388 = vmatprep.subr.bf16.mxu0 %v1593_v0  ;;  %v1440_v54 = vpack.c.bf16 %v648_v53, %v647_v52  ;;  %v865_v52 = vld [vmem:[#allocation7 + $0x7] ss:$0 sm:$0xff] }
 0x217   :  { %1390 = vmatpush3.bf16.msra.mxu0 %v1389_v56  ;;  %v650_v56 = vld [vmem:[#allocation5 + $0x358] sm:$0xff] }
 0x218   :  { %1391 = vmatprep.subr.bf16.mxu0 %v1593_v0  ;;  %v1443_v57 = vpack.c.bf16 %v650_v56, %v649_v55 }
 0x21b   :  { %1393 = vmatpush3.bf16.msra.mxu0 %v1392_v59  ;;  %v652_v59 = vld [vmem:[#allocation5 + $0x368] sm:$0xff] }
 0x21c   :  { %1394 = vmatprep.subr.bf16.mxu0 %v1593_v0  ;;  %v1446_v60 = vpack.c.bf16 %v652_v59, %v651_v58 }
 0x21f   :  { %1396 = vmatpush3.bf16.msra.mxu0 %v1395_v62 }
 0x220   :  { %1397 = vmatprep.subr.bf16.mxu0 %v1593_v0 }
 0x223   :  { %1399 = vmatpush3.bf16.msra.mxu0 %v1398_v3 }
 0x224   :  { %1400 = vmatprep.subr.bf16.mxu0 %v1593_v0 }
 0x227   :  { %1402 = vmatpush3.bf16.msra.mxu0 %v1401_v9  ;;  %v536_v9 = vsel %vm535_vm3, %v1672_v47, 0.0  ;;  %v738_v47 = vld [vmem:[#allocation5 + $0x398] sm:$0xff] }
 0x228   :  { %1427 = vmatprep.subr.bf16.mxu0 %v1593_v0 }
 0x2dd   :  { %v338_v13 = vpop.f32.mrb[2].mxu0 }
 0x2de   :  { %v339_v14 = vadd.f32 %v860_v10, %v338_v13  ;;  %v1107_v15 = vpop.f32.mrb[3].mxu0  ;;  %v861_v10 = vld [vmem:[#allocation7 + $0x3] ss:$0 sm:$0xff] }
 0x2df   :  { %v653_v15 = vld [vmem:[#allocation5 + $0x370] sm:$0xff] }
 0x2e0   :  { %v1708_v17 = vmax.f32 %v339_v14, 0.0 }
 0x2e2   :  { %1141 = vmatmul.mubr.f32.vlgmr.msra.gmra.mrb[2].mxu1 %v1708_v17  ;;  %1176 = vmatmul.mubr.f32.vlgmr.msra.gmra.mrb[4].mxu0 %v1708_v17 }
 0x2e3   :  { %1405 = vmatpush3.bf16.msra.mxu1 %v1404_v16  ;;  %1210 = vmatprep.mubr.msk.f32.mxu1 %vm1594_vm0, %v1595_v1  ;;  %v654_v16 = vld [vmem:[#allocation5 + $0x378] sm:$0xff] }
 0x2e4   :  { %1406 = vmatprep.subr.bf16.mxu1 %v1593_v0  ;;  %1245 = vmatprep.mubr.msk.f32.mxu0 %vm1594_vm0, %v1595_v1  ;;  %v1449_v18 = vpack.c.bf16 %v654_v16, %v653_v15 }
 0x2e5   :  { %1429 = vmatpush3.bf16.msra.mxu0 %v1428_v42 }
 0x2e6   :  { %1430 = vmatprep.subr.bf16.mxu0 %v1593_v0 }
 0x2e7   :  { %1408 = vmatpush3.bf16.msra.mxu1 %v1407_v20  ;;  %v736_v20 = vld [vmem:[#allocation5 + $0x388] sm:$0xff] }
 0x2e8   :  { %1409 = vmatprep.subr.bf16.mxu1 %v1593_v0  ;;  %v1452_v22 = vpack.c.bf16 %v736_v20, %v735_v19 }
 0x2e9   :  { %1432 = vmatpush3.bf16.msra.mxu0 %v1431_v44  ;;  %v750_v44 = vld [vmem:[#allocation5 + $0x3f8] sm:$0xff] }
 0x2ea   :  { %1433 = vmatprep.subr.bf16.mxu0 %v1593_v0  ;;  %v1473_v45 = vpack.c.bf16 %v750_v44, %v749_v43 }
 0x2eb   :  { %1411 = vmatpush3.bf16.msra.mxu1 %v1410_v23  ;;  %v1455_v23 = vpack.c.bf16 %v738_v47, %v737_v21 }
 0x2ec   :  { %1412 = vmatprep.subr.bf16.mxu1 %v1593_v0 }
 0x2ed   :  { %1435 = vmatpush3.bf16.msra.mxu0 %v1434_v48 }
 0x2ee   :  { %1436 = vmatprep.subr.bf16.mxu0 %v1593_v0 }
 0x2ef   :  { %1414 = vmatpush3.bf16.msra.mxu1 %v1413_v26  ;;  %v1458_v26 = vpack.c.bf16 %v740_v25, %v739_v24 }
 0x2f0   :  { %1415 = vmatprep.subr.bf16.mxu1 %v1593_v0 }
 0x2f1   :  { %1438 = vmatpush3.bf16.msra.mxu0 %v1437_v51 }
 0x2f2   :  { %1439 = vmatprep.subr.bf16.mxu0 %v1593_v0 }
 0x2f3   :  { %1417 = vmatpush3.bf16.msra.mxu1 %v1416_v29  ;;  %v743_v29 = vld [vmem:[#allocation5 + $0x3c0] sm:$0xff] }
 0x2f4   :  { %1418 = vmatprep.subr.bf16.mxu1 %v1593_v0  ;;  %v1464_v31 = vpack.c.bf16 %v744_v30, %v743_v29 }
 0x2f5   :  { %1441 = vmatpush3.bf16.msra.mxu0 %v1440_v54 }
 0x2f6   :  { %1442 = vmatprep.subr.bf16.mxu0 %v1593_v0 }
 0x2f7   :  { %1420 = vmatpush3.bf16.msra.mxu1 %v1419_v32  ;;  %v745_v32 = vld [vmem:[#allocation5 + $0x3d0] sm:$0xff] }
 0x2f8   :  { %1421 = vmatprep.subr.bf16.mxu1 %v1593_v0  ;;  %v1467_v34 = vpack.c.bf16 %v746_v33, %v745_v32 }
 0x2f9   :  { %1444 = vmatpush3.bf16.msra.mxu0 %v1443_v57 }
 0x2fa   :  { %1445 = vmatprep.subr.bf16.mxu0 %v1593_v0 }
 0x2fb   :  { %1423 = vmatpush3.bf16.msra.mxu1 %v1422_v35  ;;  %v747_v35 = vld [vmem:[#allocation5 + $0x3e0] sm:$0xff] }
 0x2fc   :  { %1424 = vmatprep.subr.bf16.mxu1 %v1593_v0  ;;  %v1470_v37 = vpack.c.bf16 %v748_v36, %v747_v35 }
 0x2fd   :  { %1447 = vmatpush3.bf16.msra.mxu0 %v1446_v60 }
 0x2fe   :  { %1448 = vmatprep.subr.bf16.mxu0 %v1593_v0 }
 0x2ff   :  { %1426 = vmatpush3.bf16.msra.mxu1 %v1425_v38  ;;  %v863_v38 = vld [vmem:[#allocation7 + $0x5] ss:$0 sm:$0xff] }
 0x300   :  { %1451 = vmatprep.subr.bf16.mxu1 %v1593_v0 }
 0x301   :  { %1450 = vmatpush3.bf16.msra.mxu0 %v1449_v18 }
 0x3b5   :  { %v434_v62 = vpop.f32.mrb[2].mxu1  ;;  %v529_v63 = vpop.f32.mrb[4].mxu0 }
 0x3b6   :  { %v530_v3 = vadd.f32 %v862_v61, %v529_v63  ;;  %v1142_v4 = vpop.f32.mrb[3].mxu1  ;;  %v1177_v5 = vpop.f32.mrb[5].mxu0  ;;  %v435_v12 = vadd.f32 %v861_v10, %v434_v62 }
 0x3b8   :  { %v537_v6 = vmul.f32 0.5, %v530_v3 }
 0x3ba   :  { %v538_v8 = vmul.f32 1.442695, %v537_v6 }
 0x3bc   :  { %1486 = vpow2.f32 %v538_v8 }
 0x3c6   :  { %v1487_v11 = vpop.eup %1486 }
 0x3c7   :  { %v540_v13 = vmul.f32 %v1487_v11, %v536_v9 }
 0x3c9   :  { %v1736_v14 = vadd.f32 %v540_v13, %v435_v12 }
 0x3cb   :  { %1211 = vmatmul.mubr.f32.vlgmr.msra.gmra.mrb[4].mxu1 %v1736_v14  ;;  %v839_v59 = vadd.f32 %v1736_v14, %v1708_v17 }
 0x3cc   :  { %1280 = vmatprep.mubr.msk.f32.mxu1 %vm1594_vm0, %v1595_v1  ;;  %1453 = vmatpush3.bf16.msra.mxu1 %v1452_v22  ;;  %v741_v1 = vld [vmem:[#allocation5 + $0x3b0] sm:$0xff] }
 0x3cd   :  { %1454 = vmatprep.subr.bf16.mxu1 %v1593_v0  ;;  %v1461_v28 = vpack.c.bf16 %v742_v27, %v741_v1 }
 0x3d0   :  { %1456 = vmatpush3.bf16.msra.mxu1 %v1455_v23 }
 0x3d1   :  { %1457 = vmatprep.subr.bf16.mxu1 %v1593_v0 }
 0x3d4   :  { %1459 = vmatpush3.bf16.msra.mxu1 %v1458_v26 }
 0x3d5   :  { %1460 = vmatprep.subr.bf16.mxu1 %v1593_v0 }
 0x3d8   :  { %1462 = vmatpush3.bf16.msra.mxu1 %v1461_v28 }
 0x3d9   :  { %1463 = vmatprep.subr.bf16.mxu1 %v1593_v0 }
 0x3dc   :  { %1465 = vmatpush3.bf16.msra.mxu1 %v1464_v31 }
 0x3dd   :  { %1466 = vmatprep.subr.bf16.mxu1 %v1593_v0 }
 0x3e0   :  { %1468 = vmatpush3.bf16.msra.mxu1 %v1467_v34 }
 0x3e1   :  { %1469 = vmatprep.subr.bf16.mxu1 %v1593_v0 }
 0x3e4   :  { %1471 = vmatpush3.bf16.msra.mxu1 %v1470_v37 }
 0x3e5   :  { %1472 = vmatprep.subr.bf16.mxu1 %v1593_v0 }
 0x3e8   :  { %1474 = vmatpush3.bf16.msra.mxu1 %v1473_v45 }
 0x49e   :  { %v633_v39 = vpop.f32.mrb[4].mxu1 }
 0x49f   :  { %v634_v40 = vadd.f32 %v863_v38, %v633_v39  ;;  %v1212_v41 = vpop.f32.mrb[5].mxu1 }
 0x4a1   :  { %v637_v42 = vmax.f32 %v634_v40, 0.0 }
 0x4a3   :  { %1246 = vmatmul.mubr.f32.vlgmr.msra.gmra.mrb[6].mxu0 %v637_v42 }
 0x576   :  { %v729_v48 = vpop.f32.mrb[6].mxu0 }
 0x577   :  { %v730_v49 = vadd.f32 %v864_v46, %v729_v48  ;;  %v1247_v50 = vpop.f32.mrb[7].mxu0 }
 0x579   :  { %v733_v51 = vmax.f32 %v730_v49, 0.0 }
 0x57b   :  { %1281 = vmatmul.mubr.f32.vlgmr.msra.gmra.mrb[6].mxu1 %v733_v51 }
 0x64e   :  { %v825_v53 = vpop.f32.mrb[6].mxu1 }
 0x64f   :  { %v826_v54 = vadd.f32 %v865_v52, %v825_v53  ;;  %v1282_v0 = vpop.f32.mrb[7].mxu1 }
 0x651   :  { %v866_v55 = vmul.f32 -1.442695, %v826_v54 }
 0x653   :  { %1488 = vpow2.f32 %v866_v55 }
 0x65d   :  { %v1489_v56 = vpop.eup %1488 }
 0x65e   :  { %v835_v57 = vadd.f32 1.0, %v1489_v56 }
 0x660   :  { %1490 = vrcp.f32 %v835_v57 }
 0x66a   :  { %v1491_v58 = vpop.eup %1490 }
 0x66b   :  { %v838_v60 = vsel %vm831_vm6, %v1491_v58, 0.0 }
 0x66c   :  { %v840_v61 = vadd.f32 %v839_v59, %v838_v60 }
 0x66e   :  { %841 = vst [vmem:[#allocation8] sm:$0xff] %v840_v61 }
 0x66f   :  { %1569 = shalt.err (!%p1566_p0)
}
 0x670   :  { %s1570_s27 = scalar_lea.hbm %s1767_s3, 128 }
 0x671   :  { %p1571_p1 = scmp.ne.s32.totalorder %s1767_s3, %s1570_s27  ;;  %p1574_p2 = scmp.lt.u32.totalorder %s1570_s27, %s1767_s3 }
 0x673   :  { %p1576_p3 = pnand %p1574_p2, %p1571_p1 }
 0x675   :  { %1579 = shalt.err (!%p1576_p3)
}
 0x676   :  { %851 = dma.vmem_to_hbm [thread:$0]  %s849_s23, 128, %s1767_s3, [#allocation4]  }
 0x677   :  { %1584 = dma.done.wait [#allocation4], 128  }
 0x678   :  { %1585 = vsyncadd [#allocation4], 4294967168 }
 0x679   :  { %855 = vsyncpa [#allocation3], 1 }
 0x67a   :  { %856 = vsyncpa [#allocation6], 1 }
 0x67b   :  { %857 = vsyncpa [#allocation4], 1 }

</bundles_post_ra>
